<compile_context>
chip_gen: v7x
topology: tpu7x:2x2x1
jax: 0.10.0
libtpu: 0.0.40
codegen_flags: <defaults>
</compile_context>

<pallas_src>
import jax
import jax.numpy as jnp
from jax import lax
from jax.experimental import pallas as pl
from jax.experimental.pallas import tpu as pltpu


_VMEM_LIMIT_BYTES = 32 * 1024 * 1024  # fits scoped VMEM on v5e/v6e/v7x


def _roi_kernel(orig_ref, attk_ref, a_ref, b_ref, o1_ref, o2_ref, k_vmem):
    """One grid step == `bt` batches.

    orig_ref/attk_ref : (bt, C, H*W)  features, spatial flattened (contiguous reshape)
    a_ref             : (bt, H, Nn)   a[h, i*bin+j] = Wy[i, h]  (zero cols for n >= bin^2)
    b_ref             : (bt, W, Nn)   b[w, i*bin+j] = Wx[j, w]
    o1_ref/o2_ref     : (bt, C, Nn)   out[c, i*bin+j]  (Nn is a multiple of 128 -> dense stores)
    k_vmem            : (H*W, Nn)     scratch: fused sampling matrix, rebuilt per batch
    """
    bt = orig_ref.shape[0]
    H = a_ref.shape[1]
    W = b_ref.shape[1]
    cdt = k_vmem.dtype

    def body(b, carry):
        a_b = a_ref[b]                    # (H, Nn)  tiny
        b_b = b_ref[b]                    # (W, Nn)  tiny
        # Build K[h*W + w, n] = a_b[h, n] * b_b[w, n] on the VPU (idle under MXU).
        for h in range(H):                # static unroll over small H
            k_vmem[h * W:(h + 1) * W, :] = a_b[h:h + 1, :] * b_b
        k = k_vmem[...]
        # One MXU matmul per feature tensor: (C, H*W) @ (H*W, Nn) -> (C, Nn).
        o1_ref[b] = jnp.dot(orig_ref[b].astype(cdt), k,
                            preferred_element_type=jnp.float32).astype(o1_ref.dtype)
        o2_ref[b] = jnp.dot(attk_ref[b].astype(cdt), k,
                            preferred_element_type=jnp.float32).astype(o2_ref.dtype)
        return carry

    lax.fori_loop(0, bt, body, 0, unroll=True)


def _bilinear_weights(coord, size):
    """coord: (B, bin) normalized coords in [-1, 1].  Returns (B, bin, size)
    per-axis weights matching torch.nn.functional.grid_sample
    (mode='bilinear', padding_mode='zeros', align_corners=False)."""
    pix = ((coord + 1.0) * size - 1.0) * 0.5
    i0f = jnp.floor(pix)
    w1 = pix - i0f
    w0 = 1.0 - w1
    i0 = i0f.astype(jnp.int32)
    i1 = i0 + 1
    v0 = ((i0 >= 0) & (i0 < size)).astype(coord.dtype)
    v1 = ((i1 >= 0) & (i1 < size)).astype(coord.dtype)
    oh0 = jax.nn.one_hot(jnp.clip(i0, 0, size - 1), size, dtype=coord.dtype)
    oh1 = jax.nn.one_hot(jnp.clip(i1, 0, size - 1), size, dtype=coord.dtype)
    return oh0 * (w0 * v0)[..., None] + oh1 * (w1 * v1)[..., None]


def _pick_batch_tile(B, per_batch_bytes, scratch_bytes, vmem_limit, user_bt=None):
    if user_bt is not None:
        bt = int(user_bt)
    else:
        budget = int(vmem_limit * 0.6) - scratch_bytes
        bt = budget // max(per_batch_bytes, 1)
    bt = max(1, min(bt, B))
    if B >= 2:
        bt = max(1, min(bt, B // 2))   # keep grid >= 2 so both v7x TCs get work
    for d in range(bt, 0, -1):         # largest divisor of B <= bt
        if B % d == 0:
            return d
    return 1


def roi_feature_forward(original_features, lab, attack_features, bin_size,
                        batch_tile=None):
    B, C, H, W = original_features.shape
    assert attack_features.shape == (B, C, H, W)
    bb = bin_size * bin_size
    Nn = ((bb + 127) // 128) * 128          # lane-dense padded output minor dim
    hw = H * W
    cdt = jnp.promote_types(original_features.dtype, attack_features.dtype)
    lab32 = lab.astype(jnp.float32)

    # ---- separable bilinear sampling weights (tiny; plain-JAX glue) --------
    # Matches the PyTorch module exactly: int(bin_size / 2); mesh_y is the x
    # (width/column) coordinate, mesh_x is the y (height/row) coordinate.
    idx = jnp.arange(bin_size, dtype=jnp.float32) - float(int(bin_size / 2))
    mesh_y = 2.0 * idx[None, :] * lab32[:, 0, 3:4] / bin_size + (lab32[:, 0, 1:2] * 2.0 - 1.0)
    mesh_x = 2.0 * idx[None, :] * lab32[:, 0, 4:5] / bin_size + (lab32[:, 0, 2:3] * 2.0 - 1.0)
    wy = _bilinear_weights(mesh_x, H)       # (B, bin, H)  height weights (rows i)
    wx = _bilinear_weights(mesh_y, W)       # (B, bin, W)  width  weights (cols j)

    # Expand along the fused output index n = i*bin + j (still tiny: (H+W)*Nn/batch).
    a_exp = jnp.repeat(jnp.swapaxes(wy, 1, 2), bin_size, axis=2)   # (B,H,bb): a[h,n]=wy[n//bin,h]
    b_exp = jnp.tile(jnp.swapaxes(wx, 1, 2), (1, 1, bin_size))     # (B,W,bb): b[w,n]=wx[n%bin,w]
    if Nn > bb:
        a_exp = jnp.pad(a_exp, ((0, 0), (0, 0), (0, Nn - bb)))     # zero pad -> padded out cols = 0
        b_exp = jnp.pad(b_exp, ((0, 0), (0, 0), (0, Nn - bb)))
    a_exp = a_exp.astype(cdt)
    b_exp = b_exp.astype(cdt)

    # Features: contiguous reshape only — no concat, no transpose, no dtype copy.
    orig2 = original_features.reshape(B, C, hw)
    attk2 = attack_features.reshape(B, C, hw)

    # ---- batch tile from an explicit VMEM budget ----------------------------
    it_o = orig2.dtype.itemsize
    it_a = attk2.dtype.itemsize
    it_c = jnp.dtype(cdt).itemsize
    in_bytes_per_batch = C * hw * (it_o + it_a) + (H + W) * Nn * it_c
    out_bytes_per_batch = C * Nn * (it_o + it_a)
    per_batch = 2 * (in_bytes_per_batch + out_bytes_per_batch)   # double-buffered
    scratch_bytes = hw * Nn * it_c
    bt = _pick_batch_tile(B, per_batch, scratch_bytes, _VMEM_LIMIT_BYTES, batch_tile)
    grid = (B // bt,)

    cost = pl.CostEstimate(
        flops=2 * 2 * B * C * hw * Nn,
        transcendentals=0,
        bytes_accessed=B * (in_bytes_per_batch + out_bytes_per_batch))

    o1, o2 = pl.pallas_call(
        _roi_kernel,
        out_shape=(jax.ShapeDtypeStruct((B, C, Nn), original_features.dtype),
                   jax.ShapeDtypeStruct((B, C, Nn), attack_features.dtype)),
        grid=grid,
        in_specs=[
            pl.BlockSpec((bt, C, hw), lambda i: (i, 0, 0)),
            pl.BlockSpec((bt, C, hw), lambda i: (i, 0, 0)),
            pl.BlockSpec((bt, H, Nn), lambda i: (i, 0, 0)),
            pl.BlockSpec((bt, W, Nn), lambda i: (i, 0, 0)),
        ],
        out_specs=(
            pl.BlockSpec((bt, C, Nn), lambda i: (i, 0, 0)),
            pl.BlockSpec((bt, C, Nn), lambda i: (i, 0, 0)),
        ),
        scratch_shapes=[pltpu.VMEM((hw, Nn), cdt)],
        compiler_params=pltpu.CompilerParams(
            dimension_semantics=("parallel",),
            vmem_limit_bytes=_VMEM_LIMIT_BYTES),
        cost_estimate=cost,
    )(orig2, attk2, a_exp, b_exp)

    # Tiny wrapper-side layout plumbing: drop lane padding, restore (B, C, bin, bin).
    o1 = o1[:, :, :bb].reshape(B, C, bin_size, bin_size)
    o2 = o2[:, :, :bb].reshape(B, C, bin_size, bin_size)
    return o1, o2


def _grid_sample_ref(feat, grid):
    """Plain-JAX bilinear grid_sample (zeros padding, align_corners=False)."""
    B, C, H, W = feat.shape
    x = grid[..., 0]
    y = grid[..., 1]
    ix = ((x + 1.0) * W - 1.0) * 0.5
    iy = ((y + 1.0) * H - 1.0) * 0.5
    x0 = jnp.floor(ix)
    y0 = jnp.floor(iy)
    wx1 = ix - x0
    wy1 = iy - y0
    wx0 = 1.0 - wx1
    wy0 = 1.0 - wy1

    def corner(yi, xi):
        valid = ((xi >= 0) & (xi < W) & (yi >= 0) & (yi < H)).astype(feat.dtype)
        xc = jnp.clip(xi, 0, W - 1).astype(jnp.int32)
        yc = jnp.clip(yi, 0, H - 1).astype(jnp.int32)
        v = jax.vmap(lambda f, yy, xx: f[:, yy, xx])(feat, yc, xc)  # (B,C,bin,bin)
        return v * valid[:, None, :, :]

    return (corner(y0, x0) * (wy0 * wx0)[:, None]
            + corner(y0, x0 + 1) * (wy0 * wx1)[:, None]
            + corner(y0 + 1, x0) * (wy1 * wx0)[:, None]
            + corner(y0 + 1, x0 + 1) * (wy1 * wx1)[:, None])


if __name__ == "__main__":
    B, C, H, W = 2, 4, 16, 16
    BIN = 8

    key = jax.random.PRNGKey(0)
    k1, k2, k3, k4 = jax.random.split(key, 4)
    orig = jax.random.normal(k1, (B, C, H, W), dtype=jnp.float32)
    attack = jax.random.normal(k2, (B, C, H, W), dtype=jnp.float32)
    centers = jax.random.uniform(k3, (B, 2), minval=0.3, maxval=0.7)
    sizes = jax.random.uniform(k4, (B, 2), minval=0.2, maxval=0.6)
    # lab layout: [cls, cy, cx, h, w] — only indices 1..4 are used by the module.
    lab = jnp.concatenate([jnp.zeros((B, 1)), centers, sizes],
                          axis=1).reshape(B, 1, 5).astype(jnp.float32)

    out1, out2 = roi_feature_forward(orig, lab, attack, BIN)
    jax.block_until_ready((out1, out2))

    # Sanity check against a gather-based grid_sample reference (same grid as module).
    idx = jnp.arange(BIN, dtype=jnp.float32) - float(int(BIN / 2))
    mesh_y = 2.0 * idx[None, :] * lab[:, 0, 3:4] / BIN + (lab[:, 0, 1:2] * 2.0 - 1.0)
    mesh_x = 2.0 * idx[None, :] * lab[:, 0, 4:5] / BIN + (lab[:, 0, 2:3] * 2.0 - 1.0)
    grid = jnp.stack(
        [jnp.broadcast_to(mesh_y[:, None, :], (B, BIN, BIN)),   # x coord (cols)
         jnp.broadcast_to(mesh_x[:, :, None], (B, BIN, BIN))],  # y coord (rows)
        axis=-1)
    ref1 = _grid_sample_ref(orig, grid)
    ref2 = _grid_sample_ref(attack, grid)
    assert out1.shape == (B, C, BIN, BIN) and out2.shape == (B, C, BIN, BIN)
    assert jnp.allclose(out1, ref1, atol=1e-5), float(jnp.max(jnp.abs(out1 - ref1)))
    assert jnp.allclose(out2, ref2, atol=1e-5), float(jnp.max(jnp.abs(out2 - ref2)))

    print("KERNEL_OK")
</pallas_src>

<mosaic_0001>
module attributes {stable_mosaic.version = 11 : i64} {
  func.func @_roi_kernel(%arg0: i32, %arg1: memref<1x4x256xf32, #tpu.memory_space<vmem>>, %arg2: memref<1x4x256xf32, #tpu.memory_space<vmem>>, %arg3: memref<1x16x128xf32, #tpu.memory_space<vmem>>, %arg4: memref<1x16x128xf32, #tpu.memory_space<vmem>>, %arg5: memref<1x4x128xf32, #tpu.memory_space<vmem>>, %arg6: memref<1x4x128xf32, #tpu.memory_space<vmem>>, %arg7: memref<256x128xf32, #tpu.memory_space<vmem>>) attributes {dimension_semantics = [#tpu.dimension_semantics<parallel>], iteration_bounds = array<i64: 2>, scalar_prefetch = 0 : i64, scratch_operands = 1 : i64, tpu.core_type = #tpu.core_type<tc>, window_params = [{transform_indices = @transform_0, window_bounds = array<i64: 1, 4, 256>}, {transform_indices = @transform_1, window_bounds = array<i64: 1, 4, 256>}, {transform_indices = @transform_2, window_bounds = array<i64: 1, 16, 128>}, {transform_indices = @transform_3, window_bounds = array<i64: 1, 16, 128>}, {transform_indices = @transform_4, window_bounds = array<i64: 1, 4, 128>}, {transform_indices = @transform_5, window_bounds = array<i64: 1, 4, 128>}]} {
    %c0_i32 = arith.constant 0 : i32
    %0 = arith.index_cast %c0_i32 : i32 to index
    %c0 = arith.constant 0 : index
    %c0_0 = arith.constant 0 : index
    %1 = vector.load %arg3[%0, %c0, %c0_0] : memref<1x16x128xf32, #tpu.memory_space<vmem>>, vector<1x16x128xf32>
    %2 = vector.shape_cast %1 : vector<1x16x128xf32> to vector<16x128xf32>
    %3 = arith.index_cast %c0_i32 : i32 to index
    %c0_1 = arith.constant 0 : index
    %c0_2 = arith.constant 0 : index
    %4 = vector.load %arg4[%3, %c0_1, %c0_2] : memref<1x16x128xf32, #tpu.memory_space<vmem>>, vector<1x16x128xf32>
    %5 = vector.shape_cast %4 : vector<1x16x128xf32> to vector<16x128xf32>
    %6 = vector.extract_strided_slice %2 {offsets = [0, 0], sizes = [1, 128], strides = [1, 1]} : vector<16x128xf32> to vector<1x128xf32>
    %7 = vector.broadcast %6 : vector<1x128xf32> to vector<16x128xf32>
    %8 = arith.mulf %7, %5 : vector<16x128xf32>
    %c0_3 = arith.constant 0 : index
    %c0_4 = arith.constant 0 : index
    %9 = vector.load %arg7[%c0_3, %c0_4] : memref<256x128xf32, #tpu.memory_space<vmem>>, vector<16x128xf32>
    tpu.vector_store %arg7[%c0_3, %c0_4], %8 {strides = array<i32>} : memref<256x128xf32, #tpu.memory_space<vmem>>, vector<16x128xf32>,
    %10 = vector.extract_strided_slice %2 {offsets = [1, 0], sizes = [1, 128], strides = [1, 1]} : vector<16x128xf32> to vector<1x128xf32>
    %11 = vector.broadcast %10 : vector<1x128xf32> to vector<16x128xf32>
    %12 = arith.mulf %11, %5 : vector<16x128xf32>
    %c16 = arith.constant 16 : index
    %c0_5 = arith.constant 0 : index
    %13 = vector.load %arg7[%c16, %c0_5] : memref<256x128xf32, #tpu.memory_space<vmem>>, vector<16x128xf32>
    tpu.vector_store %arg7[%c16, %c0_5], %12 {strides = array<i32>} : memref<256x128xf32, #tpu.memory_space<vmem>>, vector<16x128xf32>,
    %14 = vector.extract_strided_slice %2 {offsets = [2, 0], sizes = [1, 128], strides = [1, 1]} : vector<16x128xf32> to vector<1x128xf32>
    %15 = vector.broadcast %14 : vector<1x128xf32> to vector<16x128xf32>
    %16 = arith.mulf %15, %5 : vector<16x128xf32>
    %c32 = arith.constant 32 : index
    %c0_6 = arith.constant 0 : index
    %17 = vector.load %arg7[%c32, %c0_6] : memref<256x128xf32, #tpu.memory_space<vmem>>, vector<16x128xf32>
    tpu.vector_store %arg7[%c32, %c0_6], %16 {strides = array<i32>} : memref<256x128xf32, #tpu.memory_space<vmem>>, vector<16x128xf32>,
    %18 = vector.extract_strided_slice %2 {offsets = [3, 0], sizes = [1, 128], strides = [1, 1]} : vector<16x128xf32> to vector<1x128xf32>
    %19 = vector.broadcast %18 : vector<1x128xf32> to vector<16x128xf32>
    %20 = arith.mulf %19, %5 : vector<16x128xf32>
    %c48 = arith.constant 48 : index
    %c0_7 = arith.constant 0 : index
    %21 = vector.load %arg7[%c48, %c0_7] : memref<256x128xf32, #tpu.memory_space<vmem>>, vector<16x128xf32>
    tpu.vector_store %arg7[%c48, %c0_7], %20 {strides = array<i32>} : memref<256x128xf32, #tpu.memory_space<vmem>>, vector<16x128xf32>,
    %22 = vector.extract_strided_slice %2 {offsets = [4, 0], sizes = [1, 128], strides = [1, 1]} : vector<16x128xf32> to vector<1x128xf32>
    %23 = vector.broadcast %22 : vector<1x128xf32> to vector<16x128xf32>
    %24 = arith.mulf %23, %5 : vector<16x128xf32>
    %c64 = arith.constant 64 : index
    %c0_8 = arith.constant 0 : index
    %25 = vector.load %arg7[%c64, %c0_8] : memref<256x128xf32, #tpu.memory_space<vmem>>, vector<16x128xf32>
    tpu.vector_store %arg7[%c64, %c0_8], %24 {strides = array<i32>} : memref<256x128xf32, #tpu.memory_space<vmem>>, vector<16x128xf32>,
    %26 = vector.extract_strided_slice %2 {offsets = [5, 0], sizes = [1, 128], strides = [1, 1]} : vector<16x128xf32> to vector<1x128xf32>
    %27 = vector.broadcast %26 : vector<1x128xf32> to vector<16x128xf32>
    %28 = arith.mulf %27, %5 : vector<16x128xf32>
    %c80 = arith.constant 80 : index
    %c0_9 = arith.constant 0 : index
    %29 = vector.load %arg7[%c80, %c0_9] : memref<256x128xf32, #tpu.memory_space<vmem>>, vector<16x128xf32>
    tpu.vector_store %arg7[%c80, %c0_9], %28 {strides = array<i32>} : memref<256x128xf32, #tpu.memory_space<vmem>>, vector<16x128xf32>,
    %30 = vector.extract_strided_slice %2 {offsets = [6, 0], sizes = [1, 128], strides = [1, 1]} : vector<16x128xf32> to vector<1x128xf32>
    %31 = vector.broadcast %30 : vector<1x128xf32> to vector<16x128xf32>
    %32 = arith.mulf %31, %5 : vector<16x128xf32>
    %c96 = arith.constant 96 : index
    %c0_10 = arith.constant 0 : index
    %33 = vector.load %arg7[%c96, %c0_10] : memref<256x128xf32, #tpu.memory_space<vmem>>, vector<16x128xf32>
    tpu.vector_store %arg7[%c96, %c0_10], %32 {strides = array<i32>} : memref<256x128xf32, #tpu.memory_space<vmem>>, vector<16x128xf32>,
    %34 = vector.extract_strided_slice %2 {offsets = [7, 0], sizes = [1, 128], strides = [1, 1]} : vector<16x128xf32> to vector<1x128xf32>
    %35 = vector.broadcast %34 : vector<1x128xf32> to vector<16x128xf32>
    %36 = arith.mulf %35, %5 : vector<16x128xf32>
    %c112 = arith.constant 112 : index
    %c0_11 = arith.constant 0 : index
    %37 = vector.load %arg7[%c112, %c0_11] : memref<256x128xf32, #tpu.memory_space<vmem>>, vector<16x128xf32>
    tpu.vector_store %arg7[%c112, %c0_11], %36 {strides = array<i32>} : memref<256x128xf32, #tpu.memory_space<vmem>>, vector<16x128xf32>,
    %38 = vector.extract_strided_slice %2 {offsets = [8, 0], sizes = [1, 128], strides = [1, 1]} : vector<16x128xf32> to vector<1x128xf32>
    %39 = vector.broadcast %38 : vector<1x128xf32> to vector<16x128xf32>
    %40 = arith.mulf %39, %5 : vector<16x128xf32>
    %c128 = arith.constant 128 : index
    %c0_12 = arith.constant 0 : index
    %41 = vector.load %arg7[%c128, %c0_12] : memref<256x128xf32, #tpu.memory_space<vmem>>, vector<16x128xf32>
    tpu.vector_store %arg7[%c128, %c0_12], %40 {strides = array<i32>} : memref<256x128xf32, #tpu.memory_space<vmem>>, vector<16x128xf32>,
    %42 = vector.extract_strided_slice %2 {offsets = [9, 0], sizes = [1, 128], strides = [1, 1]} : vector<16x128xf32> to vector<1x128xf32>
    %43 = vector.broadcast %42 : vector<1x128xf32> to vector<16x128xf32>
    %44 = arith.mulf %43, %5 : vector<16x128xf32>
    %c144 = arith.constant 144 : index
    %c0_13 = arith.constant 0 : index
    %45 = vector.load %arg7[%c144, %c0_13] : memref<256x128xf32, #tpu.memory_space<vmem>>, vector<16x128xf32>
    tpu.vector_store %arg7[%c144, %c0_13], %44 {strides = array<i32>} : memref<256x128xf32, #tpu.memory_space<vmem>>, vector<16x128xf32>,
    %46 = vector.extract_strided_slice %2 {offsets = [10, 0], sizes = [1, 128], strides = [1, 1]} : vector<16x128xf32> to vector<1x128xf32>
    %47 = vector.broadcast %46 : vector<1x128xf32> to vector<16x128xf32>
    %48 = arith.mulf %47, %5 : vector<16x128xf32>
    %c160 = arith.constant 160 : index
    %c0_14 = arith.constant 0 : index
    %49 = vector.load %arg7[%c160, %c0_14] : memref<256x128xf32, #tpu.memory_space<vmem>>, vector<16x128xf32>
    tpu.vector_store %arg7[%c160, %c0_14], %48 {strides = array<i32>} : memref<256x128xf32, #tpu.memory_space<vmem>>, vector<16x128xf32>,
    %50 = vector.extract_strided_slice %2 {offsets = [11, 0], sizes = [1, 128], strides = [1, 1]} : vector<16x128xf32> to vector<1x128xf32>
    %51 = vector.broadcast %50 : vector<1x128xf32> to vector<16x128xf32>
    %52 = arith.mulf %51, %5 : vector<16x128xf32>
    %c176 = arith.constant 176 : index
    %c0_15 = arith.constant 0 : index
    %53 = vector.load %arg7[%c176, %c0_15] : memref<256x128xf32, #tpu.memory_space<vmem>>, vector<16x128xf32>
    tpu.vector_store %arg7[%c176, %c0_15], %52 {strides = array<i32>} : memref<256x128xf32, #tpu.memory_space<vmem>>, vector<16x128xf32>,
    %54 = vector.extract_strided_slice %2 {offsets = [12, 0], sizes = [1, 128], strides = [1, 1]} : vector<16x128xf32> to vector<1x128xf32>
    %55 = vector.broadcast %54 : vector<1x128xf32> to vector<16x128xf32>
    %56 = arith.mulf %55, %5 : vector<16x128xf32>
    %c192 = arith.constant 192 : index
    %c0_16 = arith.constant 0 : index
    %57 = vector.load %arg7[%c192, %c0_16] : memref<256x128xf32, #tpu.memory_space<vmem>>, vector<16x128xf32>
    tpu.vector_store %arg7[%c192, %c0_16], %56 {strides = array<i32>} : memref<256x128xf32, #tpu.memory_space<vmem>>, vector<16x128xf32>,
    %58 = vector.extract_strided_slice %2 {offsets = [13, 0], sizes = [1, 128], strides = [1, 1]} : vector<16x128xf32> to vector<1x128xf32>
    %59 = vector.broadcast %58 : vector<1x128xf32> to vector<16x128xf32>
    %60 = arith.mulf %59, %5 : vector<16x128xf32>
    %c208 = arith.constant 208 : index
    %c0_17 = arith.constant 0 : index
    %61 = vector.load %arg7[%c208, %c0_17] : memref<256x128xf32, #tpu.memory_space<vmem>>, vector<16x128xf32>
    tpu.vector_store %arg7[%c208, %c0_17], %60 {strides = array<i32>} : memref<256x128xf32, #tpu.memory_space<vmem>>, vector<16x128xf32>,
    %62 = vector.extract_strided_slice %2 {offsets = [14, 0], sizes = [1, 128], strides = [1, 1]} : vector<16x128xf32> to vector<1x128xf32>
    %63 = vector.broadcast %62 : vector<1x128xf32> to vector<16x128xf32>
    %64 = arith.mulf %63, %5 : vector<16x128xf32>
    %c224 = arith.constant 224 : index
    %c0_18 = arith.constant 0 : index
    %65 = vector.load %arg7[%c224, %c0_18] : memref<256x128xf32, #tpu.memory_space<vmem>>, vector<16x128xf32>
    tpu.vector_store %arg7[%c224, %c0_18], %64 {strides = array<i32>} : memref<256x128xf32, #tpu.memory_space<vmem>>, vector<16x128xf32>,
    %66 = vector.extract_strided_slice %2 {offsets = [15, 0], sizes = [1, 128], strides = [1, 1]} : vector<16x128xf32> to vector<1x128xf32>
    %67 = vector.broadcast %66 : vector<1x128xf32> to vector<16x128xf32>
    %68 = arith.mulf %67, %5 : vector<16x128xf32>
    %c240 = arith.constant 240 : index
    %c0_19 = arith.constant 0 : index
    %69 = vector.load %arg7[%c240, %c0_19] : memref<256x128xf32, #tpu.memory_space<vmem>>, vector<16x128xf32>
    tpu.vector_store %arg7[%c240, %c0_19], %68 {strides = array<i32>} : memref<256x128xf32, #tpu.memory_space<vmem>>, vector<16x128xf32>,
    %c0_20 = arith.constant 0 : index
    %c0_21 = arith.constant 0 : index
    %70 = vector.load %arg7[%c0_20, %c0_21] : memref<256x128xf32, #tpu.memory_space<vmem>>, vector<256x128xf32>
    %71 = arith.index_cast %c0_i32 : i32 to index
    %c0_22 = arith.constant 0 : index
    %c0_23 = arith.constant 0 : index
    %72 = vector.load %arg1[%71, %c0_22, %c0_23] : memref<1x4x256xf32, #tpu.memory_space<vmem>>, vector<1x4x256xf32>
    %73 = vector.shape_cast %72 : vector<1x4x256xf32> to vector<4x256xf32>
    %cst = arith.constant dense<0.000000e+00> : vector<4x128xf32>
    %74 = tpu.matmul %73, %70, %cst {dimension_numbers = #tpu.dot_dimension_numbers<[1], [0], [0], [1], [0, 0, 1, 1], [], []>} : vector<4x256xf32>, vector<256x128xf32>, vector<4x128xf32> -> vector<4x128xf32>
    %75 = arith.index_cast %c0_i32 : i32 to index
    %c0_24 = arith.constant 0 : index
    %c0_25 = arith.constant 0 : index
    %76 = vector.load %arg5[%75, %c0_24, %c0_25] : memref<1x4x128xf32, #tpu.memory_space<vmem>>, vector<1x4x128xf32>
    %77 = vector.shape_cast %76 : vector<1x4x128xf32> to vector<4x128xf32>
    %78 = vector.shape_cast %74 : vector<4x128xf32> to vector<1x4x128xf32>
    tpu.vector_store %arg5[%75, %c0_24, %c0_25], %78 {strides = array<i32>} : memref<1x4x128xf32, #tpu.memory_space<vmem>>, vector<1x4x128xf32>,
    %79 = arith.index_cast %c0_i32 : i32 to index
    %c0_26 = arith.constant 0 : index
    %c0_27 = arith.constant 0 : index
    %80 = vector.load %arg2[%79, %c0_26, %c0_27] : memref<1x4x256xf32, #tpu.memory_space<vmem>>, vector<1x4x256xf32>
    %81 = vector.shape_cast %80 : vector<1x4x256xf32> to vector<4x256xf32>
    %cst_28 = arith.constant dense<0.000000e+00> : vector<4x128xf32>
    %82 = tpu.matmul %81, %70, %cst_28 {dimension_numbers = #tpu.dot_dimension_numbers<[1], [0], [0], [1], [0, 0, 1, 1], [], []>} : vector<4x256xf32>, vector<256x128xf32>, vector<4x128xf32> -> vector<4x128xf32>
    %83 = arith.index_cast %c0_i32 : i32 to index
    %c0_29 = arith.constant 0 : index
    %c0_30 = arith.constant 0 : index
    %84 = vector.load %arg6[%83, %c0_29, %c0_30] : memref<1x4x128xf32, #tpu.memory_space<vmem>>, vector<1x4x128xf32>
    %85 = vector.shape_cast %84 : vector<1x4x128xf32> to vector<4x128xf32>
    %86 = vector.shape_cast %82 : vector<4x128xf32> to vector<1x4x128xf32>
    tpu.vector_store %arg6[%83, %c0_29, %c0_30], %86 {strides = array<i32>} : memref<1x4x128xf32, #tpu.memory_space<vmem>>, vector<1x4x128xf32>,
    %c1_i32 = arith.constant 1 : i32
    return
  }
  func.func @transform_0(%arg0: i32) -> (i32, i32, i32) {
    %c0_i32 = arith.constant 0 : i32
    %c0_i32_0 = arith.constant 0 : i32
    %c0_i32_1 = arith.constant 0 : i32
    return %arg0, %c0_i32, %c0_i32_0 : i32, i32, i32
  }
  func.func @transform_1(%arg0: i32) -> (i32, i32, i32) {
    %c0_i32 = arith.constant 0 : i32
    %c0_i32_0 = arith.constant 0 : i32
    %c0_i32_1 = arith.constant 0 : i32
    return %arg0, %c0_i32, %c0_i32_0 : i32, i32, i32
  }
  func.func @transform_2(%arg0: i32) -> (i32, i32, i32) {
    %c0_i32 = arith.constant 0 : i32
    %c0_i32_0 = arith.constant 0 : i32
    %c0_i32_1 = arith.constant 0 : i32
    return %arg0, %c0_i32, %c0_i32_0 : i32, i32, i32
  }
  func.func @transform_3(%arg0: i32) -> (i32, i32, i32) {
    %c0_i32 = arith.constant 0 : i32
    %c0_i32_0 = arith.constant 0 : i32
    %c0_i32_1 = arith.constant 0 : i32
    return %arg0, %c0_i32, %c0_i32_0 : i32, i32, i32
  }
  func.func @transform_4(%arg0: i32) -> (i32, i32, i32) {
    %c0_i32 = arith.constant 0 : i32
    %c0_i32_0 = arith.constant 0 : i32
    %c0_i32_1 = arith.constant 0 : i32
    return %arg0, %c0_i32, %c0_i32_0 : i32, i32, i32
  }
  func.func @transform_5(%arg0: i32) -> (i32, i32, i32) {
    %c0_i32 = arith.constant 0 : i32
    %c0_i32_0 = arith.constant 0 : i32
    %c0_i32_1 = arith.constant 0 : i32
    return %arg0, %c0_i32, %c0_i32_0 : i32, i32, i32
  }
}

</mosaic_0001>

<bundles_post_ra>
// kernel: tpu_custom_call.1
= control target key start
LH: loop header
LB: loop body
LE: loop exit
PB: predicated region body
PF: predicated region fallthrough
CT: control target
= control target key end

     0   :  { %s1775_s0 = inlined_call_operand.hbm [shape: f32[2,4,256], index: 0, kind: input, shape index: {}]   ;;  %s1776_s1 = inlined_call_operand.hbm [shape: f32[2,4,256], index: 1, kind: input, shape index: {}]   ;;  %s1777_s2 = inlined_call_operand.hbm [shape: f32[2,16,128], index: 2, kind: input, shape index: {}]   ;;  %s1778_s3 = inlined_call_operand.hbm [shape: f32[2,16,128], index: 3, kind: input, shape index: {}]   ;;  %s1779_s4 = inlined_call_operand.hbm [shape: f32[2,4,128], index: 4, kind: output, shape index: {0}]   ;;  %s1780_s5 = inlined_call_operand.hbm [shape: f32[2,4,128], index: 5, kind: output, shape index: {1}]  }
   0x1   :  { %1784 = sst [smem:[#allocation20_spill]] %s1775_s0 }
   0x2   :  { %1785 = sst [smem:[#allocation21_spill]] %s1776_s1 }
   0x3   :  { %11 = vsyncpa [#allocation4], 0 }
   0x4   :  { %13 = vsyncpa [#allocation4 + $0x1], 0 }
   0x5   :  { %14 = vsyncpa [#allocation7], 0 }
   0x6   :  { %16 = vsyncpa [#allocation7 + $0x1], 0 }
   0x7   :  { %17 = vsyncpa [#allocation10], 0 }
   0x8   :  { %19 = vsyncpa [#allocation10 + $0x1], 0 }
   0x9   :  { %20 = vsyncpa [#allocation5], 0 }
   0xa   :  { %22 = vsyncpa [#allocation5 + $0x1], 0 }
   0xb   :  { %23 = vsyncpa [#allocation13], 0 }
   0xc   :  { %25 = vsyncpa [#allocation13 + $0x1], 0  ;;  %s1383_s18 = smov 0   ;;  %s1385_s19 = smov 0  }
   0xd   :  { %s1387_s20 = smov 0   ;;  %s1389_s21 = smov 0  }
   0xe LB: > { %s1404_s22 = sadd.s32 4294967295, %s1343_s21   ;;  %s881_s23 = sadd.s32 4294967294, %s1343_s21   ;;  %s1343_s21 = sphi %s1389_s21, %s1807_s21   ;;  %s1339_s20 = sphi %s1387_s20, %s1806_s20   ;;  %s1335_s19 = sphi %s1385_s19, %s1805_s19   ;;  %s1331_s18 = sphi %s1383_s18, %s1804_s18  }
   0xf   : > { %s1408_s24 = sadd.s32 1, %s1343_s21   ;;  %s38_s25 = sadd.s32 1, %s1339_s20 }
  0x10   : > { %s35_s26 = ssub.s32 %s1343_s21, %s1408_s24  ;;  %p45_p0 = scmp.ne.s32.totalorder %s1339_s20, %s1335_s19 }
  0x11   : > { %p36_p1 = scmp.eq.s32.totalorder %s35_s26, 0  ;;  %p46_p2 = scmp.eq.s32.totalorder %s1343_s21, 0 }
  0x12   : > { %p51_p3 = scmp.ne.s32.totalorder %s1335_s19, %s1331_s18  ;;  %p52_p4 = scmp.eq.s32.totalorder %s1404_s22, 0 }
  0x13   : > { %s1420_s27 = scalar_select %p36_p1, %s1339_s20, %s38_s25  }
  0x14   : > { %p47_p5 = por %p46_p2, %p45_p0  ;;  %p1422_p6 = por %p52_p4, %p51_p3 }
  0x15   : > { %1786 = sst [smem:[#allocation19_spill]] %s1420_s27  ;;  %p153_p7 = scmp.eq.s32.totalorder %s1404_s22, 1 }
  0x16   : > { %s1787_s28 = scalar_select %p1422_p6, 1, 0 }
  0x17   : > { %p159_p8 = scmp.eq.s32.totalorder %s881_s23, 1  ;;  %p1079_p10 = scmp.lt.s32.totalorder %s1343_s21, 2 }
  0x18   : > { %p1429_p11 = por %p153_p7, %p45_p0  ;;  %s1438_s6 = sand.u32 1, %s1339_s20  }
  0x19   : > { %p1433_p12 = por %p159_p8, %p51_p3  ;;  %s909_s7 = sshll.u32 %s1343_s21, 7 }
  0x1a   : > { %s1788_s29 = scalar_select %p1429_p11, 1, 0 }
  0x1b   : > { %s1789_s30 = scalar_select %p1433_p12, 1, 0 }
  0x1c   : > { %s1781_s8 = sshll.u32 %s1438_s6, 3  ;;  %p1442_p13 = pnand %p1079_p10, %p47_p5 }
  0x1d   : > { %s224_s10 = sand.u32 1, %s1343_s21   ;;  %s1791_s1 = sld [smem:[#allocation21_spill]] }
  0x1e   : > { %s228_s14 = scalar_lea.vmem [#allocation6], %s1781_s8  ;;  %s1459_s17 = scalar_lea.sflag [#allocation7], %s224_s10 }
  0x1f   : > { %s236_s15 = sshll.u32 %s228_s14, 4  ;;  %p1465_p1 = pneg %p1442_p13  ;;  %s1456_s15 = int_to_ptr.vmem [resolvable:$true] %s236_s15 }
  0x23   : > { %s1452_s13 = scalar_lea.hbm %s1791_s1, %s909_s7  ;;  %s1122_s12 = scalar_lea.hbm %s1791_s1, 256 }
  0x24   : > { %s1117_s23 = scalar_lea.hbm %s1452_s13, 128  ;;  %p1123_p4 = scmp.lt.u32.totalorder %s1452_s13, %s1791_s1 }
  0x25   : > { %p1118_p0 = scmp.ne.s32.totalorder %s1452_s13, %s1117_s23  ;;  %p1124_p5 = scmp.lt.u32.totalorder %s1122_s12, %s1117_s23 }
  0x26   : > { %p1126_p8 = scmp.lt.u32.totalorder %s1117_s23, %s1452_s13 }
  0x27   : > { %p1120_p2 = pnand %p1465_p1, %p1118_p0  ;;  %p1125_p7 = por %p1124_p5, %p1123_p4 }
  0x29   : > { %p1121_p3 = pneg %p1120_p2  ;;  %p1127_p10 = por %p1126_p8, %p1125_p7 }
  0x2b   : > { %p1128_p9 = pnand %p1127_p10, %p1121_p3 }
  0x2d   : > { %1131 = shalt.err (!%p1128_p9)
}
  0x2e   : > { %s1132_s10 = scalar_lea.vmem %s1456_s15, 128  ;;  %s1345_s26 = smov [#allocation6]  }
  0x2f   : > { %p1133_p0 = scmp.ne.s32.totalorder %s1456_s15, %s1132_s10  ;;  %s1137_s11 = sshll.u32 %s1345_s26, 4  ;;  %s1138_s11 = int_to_ptr.vmem [resolvable:$false] %s1137_s11 }
  0x30   : > { %s1139_s8 = scalar_lea.vmem %s1138_s11, 256  ;;  %p1140_p11 = scmp.lt.s32.totalorder %s1456_s15, %s1138_s11 }
  0x31   : > { %p1135_p2 = pnand %p1133_p0, %p1465_p1  ;;  %p1141_p6 = scmp.lt.s32.totalorder %s1139_s8, %s1132_s10 }
  0x33   : > { %p1136_p12 = pneg %p1135_p2  ;;  %p1142_p4 = por %p1141_p6, %p1140_p11 }
  0x35   : > { %p1143_p5 = pnand %p1142_p4, %p1136_p12 }
  0x37   : > { %1146 = shalt.err (!%p1143_p5)
}
  0x38   : > { %1065 = dma.hbm_to_vmem [thread:$0]  (!%p1442_p13), %s1452_s13, 128, %s1456_s15, %s1459_s17  }
  0x39   : > { %p896_p9 = scmp.ge.s32.totalorder %s1343_s21, 1  ;;  %p283_p3 = scmp.lt.s32.totalorder %s1343_s21, 3 }
  0x3a   : > { %s1794_s0 = sld [smem:[#allocation20_spill]]  ;;  %s1795_s26 = sshll.u32 %s1438_s6, 3 }
  0x3b   : > { %p1491_p7 = pnand %p896_p9, %p283_p3  ;;  %s209_s11 = scalar_lea.vmem [#allocation3], %s1795_s26 }
  0x3c   : > { %s217_s8 = sshll.u32 %s209_s11, 4  ;;  %s911_s13 = sshll.u32 %s1343_s21, 8  ;;  %s1504_s8 = int_to_ptr.vmem [resolvable:$true] %s217_s8 }
  0x3d   : > { %s1793_s23 = scalar_select %p1491_p7, 1, 0 }
  0x3e   : > { %s206_s15 = scalar_lea.sflag [#allocation4], %s1438_s6 }
  0x40   : > { %s1500_s10 = scalar_lea.hbm %s1794_s0, %s909_s7  ;;  %s1152_s7 = scalar_lea.hbm %s1794_s0, 256 }
  0x41   : > { %s1147_s16 = scalar_lea.hbm %s1500_s10, 128  ;;  %p1153_p8 = scmp.lt.u32.totalorder %s1500_s10, %s1794_s0 }
  0x42   : > { %p1148_p6 = scmp.ne.s32.totalorder %s1500_s10, %s1147_s16  ;;  %p1154_p10 = scmp.lt.u32.totalorder %s1152_s7, %s1147_s16 }
  0x43   : > { %p1156_p2 = scmp.lt.u32.totalorder %s1147_s16, %s1500_s10 }
  0x44   : > { %p1150_p11 = pnand %p1148_p6, %p1465_p1  ;;  %p1155_p0 = por %p1154_p10, %p1153_p8 }
  0x46   : > { %p1151_p12 = pneg %p1150_p11  ;;  %p1157_p4 = por %p1156_p2, %p1155_p0 }
  0x48   : > { %p1158_p5 = pnand %p1157_p4, %p1151_p12 }
  0x4a   : > { %1161 = shalt.err (!%p1158_p5)
}
  0x4b   : > { %s1162_s26 = scalar_lea.vmem %s1504_s8, 128  ;;  %s1346_s1 = smov [#allocation3]  }
  0x4c   : > { %p1163_p9 = scmp.ne.s32.totalorder %s1504_s8, %s1162_s26  ;;  %s1167_s11 = sshll.u32 %s1346_s1, 4  ;;  %s1168_s11 = int_to_ptr.vmem [resolvable:$false] %s1167_s11 }
  0x4d   : > { %s1169_s27 = scalar_lea.vmem %s1168_s11, 256  ;;  %p1170_p11 = scmp.lt.s32.totalorder %s1504_s8, %s1168_s11 }
  0x4e   : > { %p1165_p3 = pnand %p1163_p9, %p1465_p1  ;;  %p1171_p7 = scmp.lt.s32.totalorder %s1169_s27, %s1162_s26 }
  0x50   : > { %p1166_p6 = pneg %p1165_p3  ;;  %p1172_p8 = por %p1171_p7, %p1170_p11 }
  0x52   : > { %p1173_p10 = pnand %p1172_p8, %p1166_p6 }
  0x54   : > { %1176 = shalt.err (!%p1173_p10)
}
  0x55   : > { %1062 = dma.hbm_to_vmem [thread:$0]  (!%p1442_p13), %s1500_s10, 128, %s1504_s8, %s206_s15  }
  0x56   : > { %s1534_s7 = scalar_lea.hbm %s1777_s2, %s911_s13  ;;  %s1796_s14 = sshll.u32 %s1438_s6, 4 }
  0x57   : > { %s247_s26 = scalar_lea.vmem [#allocation8], %s1796_s14  ;;  %s1177_s11 = scalar_lea.hbm %s1534_s7, 256 }
  0x58   : > { %s254_s1 = sshll.u32 %s247_s26, 4  ;;  %p1178_p7 = scmp.ne.s32.totalorder %s1534_s7, %s1177_s11  ;;  %s1538_s1 = int_to_ptr.vmem [resolvable:$true] %s254_s1 }
  0x59   : > { %s1182_s15 = scalar_lea.hbm %s1777_s2, 512  ;;  %p1183_p2 = scmp.lt.u32.totalorder %s1534_s7, %s1777_s2 }
  0x5a   : > { %p1180_p12 = pnand %p1178_p7, %p1465_p1  ;;  %p1184_p4 = scmp.lt.u32.totalorder %s1182_s15, %s1177_s11 }
  0x5b   : > { %p1186_p9 = scmp.lt.u32.totalorder %s1177_s11, %s1534_s7 }
  0x5c   : > { %p1181_p0 = pneg %p1180_p12  ;;  %p1185_p5 = por %p1184_p4, %p1183_p2 }
  0x5e   : > { %p1187_p3 = por %p1186_p9, %p1185_p5 }
  0x60   : > { %p1188_p6 = pnand %p1187_p3, %p1181_p0 }
  0x62   : > { %1191 = shalt.err (!%p1188_p6)
}
  0x63   : > { %s1192_s12 = scalar_lea.vmem %s1538_s1, 256  ;;  %s1347_s14 = smov [#allocation8]  }
  0x64   : > { %p1193_p11 = scmp.ne.s32.totalorder %s1538_s1, %s1192_s12  ;;  %s1197_s26 = sshll.u32 %s1347_s14, 4  ;;  %s1198_s26 = int_to_ptr.vmem [resolvable:$false] %s1197_s26 }
  0x65   : > { %s1199_s10 = scalar_lea.vmem %s1198_s26, 512  ;;  %p1200_p7 = scmp.lt.s32.totalorder %s1538_s1, %s1198_s26 }
  0x66   : > { %p1195_p8 = pnand %p1193_p11, %p1465_p1  ;;  %p1201_p12 = scmp.lt.s32.totalorder %s1199_s10, %s1192_s12 }
  0x68   : > { %p1196_p10 = pneg %p1195_p8  ;;  %p1202_p2 = por %p1201_p12, %p1200_p7 }
  0x6a   : > { %p1203_p4 = pnand %p1202_p2, %p1196_p10 }
  0x6c   : > { %1206 = shalt.err (!%p1203_p4)
}
  0x6d   : > { %s1348_s11 = smov 128   ;;  %s1349_s8 = smov 8  }
  0x6e   : > { %1068 = dma.hbm_to_vmem [thread:$0]  (!%p1442_p13), %s1534_s7, 256, %s1538_s1, %s1459_s17, %s1348_s11, %s1348_s11, %s1349_s8  }
  0x6f   : > { %s1570_s16 = scalar_lea.hbm %s1778_s3, %s911_s13  ;;  %s1797_s12 = sshll.u32 %s1438_s6, 4 }
  0x70   : > { %s268_s14 = scalar_lea.vmem [#allocation9], %s1797_s12  ;;  %s265_s10 = scalar_lea.sflag [#allocation10], %s1438_s6 }
  0x71   : > { %s275_s26 = sshll.u32 %s268_s14, 4  ;;  %s1207_s0 = scalar_lea.hbm %s1570_s16, 256  ;;  %s1574_s26 = int_to_ptr.vmem [resolvable:$true] %s275_s26 }
  0x72   : > { %p1208_p0 = scmp.ne.s32.totalorder %s1570_s16, %s1207_s0  ;;  %s1212_s13 = scalar_lea.hbm %s1778_s3, 512 }
  0x73   : > { %p1213_p3 = scmp.lt.u32.totalorder %s1570_s16, %s1778_s3  ;;  %p1214_p6 = scmp.lt.u32.totalorder %s1212_s13, %s1207_s0 }
  0x74   : > { %p1210_p5 = pnand %p1208_p0, %p1465_p1  ;;  %p1216_p8 = scmp.lt.u32.totalorder %s1207_s0, %s1570_s16 }
  0x75   : > { %p1215_p11 = por %p1214_p6, %p1213_p3 }
  0x76   : > { %p1211_p9 = pneg %p1210_p5 }
  0x77   : > { %p1217_p10 = por %p1216_p8, %p1215_p11 }
  0x79   : > { %p1218_p7 = pnand %p1217_p10, %p1211_p9 }
  0x7b   : > { %1221 = shalt.err (!%p1218_p7)
}
  0x7c   : > { %s1222_s27 = scalar_lea.vmem %s1574_s26, 256  ;;  %s1350_s12 = smov [#allocation9]  }
  0x7d   : > { %p1223_p12 = scmp.ne.s32.totalorder %s1574_s26, %s1222_s27  ;;  %s1227_s14 = sshll.u32 %s1350_s12, 4  ;;  %s1228_s14 = int_to_ptr.vmem [resolvable:$false] %s1227_s14 }
  0x7e   : > { %s1229_s17 = scalar_lea.vmem %s1228_s14, 512  ;;  %p1230_p0 = scmp.lt.s32.totalorder %s1574_s26, %s1228_s14 }
  0x7f   : > { %p1225_p2 = pnand %p1223_p12, %p1465_p1  ;;  %p1231_p5 = scmp.lt.s32.totalorder %s1229_s17, %s1222_s27 }
  0x81   : > { %p1226_p4 = pneg %p1225_p2  ;;  %p1232_p3 = por %p1231_p5, %p1230_p0 }
  0x83   : > { %p1233_p6 = pnand %p1232_p3, %p1226_p4 }
  0x85   : > { %1236 = shalt.err (!%p1233_p6)
}
  0x86   : > { %1071 = dma.hbm_to_vmem [thread:$0]  (!%p1442_p13), %s1570_s16, 256, %s1574_s26, %s265_s10, %s1348_s11, %s1348_s11, %s1349_s8  }
  0x87   : > { %p1798_p1 = scmp.ne.s32.totalorder %s1793_s23, 0 }
  0x88   : > { %s1606_s0 = sand.u32 (!%p1798_p1), 1, %s1335_s19   ;;  %p1799_p9 = scmp.ne.s32.totalorder (!%p1798_p1), %s1787_s28, 0 }
  0x89   : > { %287 = sbr.rel (%p1798_p1) target bundleno = 447 (0x1bf), region = 36  ;;  %s897_s25 = sshll.u32 (!%p1798_p1), %s1606_s0, 3 }
  0x8a   : > { %s290_s7 = scalar_lea.sflag (!%p1798_p1), [#allocation4], %s1606_s0  ;;  %s1610_s9 = scalar_lea.vmem (!%p1798_p1), [#allocation3], %s897_s25 }
  0x90   : > { %1310 = dma.done.wait (%p1799_p9), %s290_s7, 128  }
  0x91   : > { %1312 = vsyncadd (%p1799_p9), %s290_s7, 4294967168  ;;  %s298_s6 = sand.u32 1, %s1404_s22   ;;  %s1617_s11 = scalar_lea.vmem [#allocation6], %s897_s25 }
  0x92   : > { %s299_s23 = scalar_lea.sflag [#allocation7], %s298_s6 }
  0x93   : > { %1314 = dma.done.wait (%p1799_p9), %s299_s23, 384  }
  0x94   : > { %1316 = vsyncadd (%p1799_p9), %s299_s23, 4294966912  ;;  %s899_s8 = sshll.u32 %s1606_s0, 4  ;;  %s317_s26 = scalar_lea.sflag [#allocation10], %s1606_s0 }
  0x95   : > { %s311_s16 = scalar_lea.vmem [#allocation8], %s899_s8  ;;  %s320_s10 = scalar_lea.vmem [#allocation9], %s899_s8 }
  0x96   : > { %1318 = dma.done.wait (%p1799_p9), %s317_s26, 256  }
  0x97   : > { %1320 = vsyncadd (%p1799_p9), %s317_s26, 4294967040  ;;  %v371_v0 = vlaneseq  ;;  %v1635_v6 = vld [vmem:[%s311_s16 + $0x8] sm:$0xff]  ;;  %v1637_v7 = vld [vmem:[%s320_s10] sm:$0xff]  ;;  %s901_s28 = sshll.u32 %s1606_s0, 2  ;;  %s905_s13 = sshll.u32 %s1404_s22, 6 }
  0x98   : > { %v1639_v8 = vld [vmem:[%s320_s10 + $0x8] sm:$0xff]  ;;  %v1642_v10 = vld [vmem:[%s311_s16] sm:$0xff]  ;;  %s359_s1 = scalar_lea.vmem [#allocation11], %s901_s28  ;;  %s366_s27 = scalar_lea.vmem [#allocation12], %s901_s28 }
  0x99   : > { %v1629_v1 = vshrl.u32 %v371_v0, 7  ;;  %v531_v45 = vld [vmem:[%s1610_s9] sm:$0xff]  ;;  %v606_v54 = vld [vmem:[%s1617_s11] sm:$0xff]  ;;  %s700_s15 = sshll.u32 %s359_s1, 4  ;;  %s713_s12 = sshll.u32 %s366_s27, 4  ;;  %s1704_s15 = int_to_ptr.vmem [resolvable:$true] %s700_s15  ;;  %s1711_s12 = int_to_ptr.vmem [resolvable:$true] %s713_s12 }
  0x9a   : > { %v533_v53 = vcombine.high %v531_v45, %v531_v45  ;;  %v608_v61 = vcombine.high %v606_v54, %v606_v54  ;;  %s1702_s25 = scalar_lea.hbm %s1779_s4, %s905_s13  ;;  %s1709_s9 = scalar_lea.hbm %s1780_s5, %s905_s13 }
  0x9b   : > { %v373_v2 = vsub.s32 0, %v1629_v1  ;;  %v381_v3 = vsub.s32 1, %v1629_v1  ;;  %v389_v4 = vsub.s32 2, %v1629_v1  ;;  %v397_v5 = vsub.s32 3, %v1629_v1  ;;  %s682_s6 = scalar_lea.sflag [#allocation5], %s1606_s0  ;;  %s1237_s23 = scalar_lea.vmem %s1704_s15, 64 }
  0x9c   : > { %v405_v13 = vsub.s32 4, %v1629_v1  ;;  %v413_v36 = vsub.s32 5, %v1629_v1  ;;  %v421_v49 = vsub.s32 6, %v1629_v1  ;;  %v429_v60 = vsub.s32 7, %v1629_v1  ;;  %599 = vmatprep.mubr.f32.mxu0 %v533_v53  ;;  %674 = vmatprep.mubr.f32.mxu1 %v608_v61  ;;  %p1238_p13 = scmp.ne.s32.totalorder %s1704_s15, %s1237_s23  ;;  %p1800_p11 = scmp.ne.s32.totalorder %s1788_s29, 0 }
  0x9d   : > { %v438_v9 = vrot.slane %v1635_v6, %v373_v2  ;;  %v446_v11 = vrot.slane %v1635_v6, %v381_v3  ;;  %v454_v12 = vrot.slane %v1635_v6, %v389_v4  ;;  %v374_v14 = vrot.slane %v1642_v10, %v373_v2  ;;  %s1351_s11 = smov [#allocation11]  }
  0x9e   : > { %v382_v15 = vrot.slane %v1642_v10, %v381_v3  ;;  %v390_v16 = vrot.slane %v1642_v10, %v389_v4  ;;  %v462_v17 = vrot.slane %v1635_v6, %v397_v5  ;;  %v398_v32 = vrot.slane %v1642_v10, %v397_v5  ;;  %p1239_p8 = pnand %p1238_p13, %p1800_p11  ;;  %s1241_s8 = sshll.u32 %s1351_s11, 4  ;;  %s1242_s8 = int_to_ptr.vmem [resolvable:$false] %s1241_s8 }
  0x9f   : > { %v439_v18 = vmul.f32 %v438_v9, %v1637_v7  ;;  %v440_v19 = vmul.f32 %v438_v9, %v1639_v8  ;;  %v447_v20 = vmul.f32 %v446_v11, %v1637_v7  ;;  %v448_v21 = vmul.f32 %v446_v11, %v1639_v8  ;;  %s1243_s16 = scalar_lea.vmem %s1242_s8, 128  ;;  %p1244_p7 = scmp.lt.s32.totalorder %s1704_s15, %s1242_s8 }
  0xa0   : > { %v375_v22 = vmul.f32 %v374_v14, %v1637_v7  ;;  %v376_v23 = vmul.f32 %v374_v14, %v1639_v8  ;;  %v383_v24 = vmul.f32 %v382_v15, %v1637_v7  ;;  %v384_v25 = vmul.f32 %v382_v15, %v1639_v8  ;;  %p1240_p10 = pneg %p1239_p8  ;;  %p1245_p12 = scmp.lt.s32.totalorder %s1243_s16, %s1237_s23 }
  0xa1   : > { %v983_v26 = vpack.c.bf16 %v440_v19, %v439_v18  ;;  %v987_v27 = vpack.c.bf16 %v448_v21, %v447_v20  ;;  %v455_v28 = vmul.f32 %v454_v12, %v1637_v7  ;;  %v456_v29 = vmul.f32 %v454_v12, %v1639_v8 }
  0xa2   : > { %v985_v30 = vpack.c.bf16 %v376_v23, %v375_v22  ;;  %v989_v31 = vpack.c.bf16 %v384_v25, %v383_v24  ;;  %v391_v34 = vmul.f32 %v390_v16, %v1637_v7  ;;  %v392_v35 = vmul.f32 %v390_v16, %v1639_v8  ;;  %p1246_p2 = por %p1245_p12, %p1244_p7 }
  0xa3   : > { %984 = vmatprep.subr.bf16.mxu0 %v983_v26  ;;  %1016 = vmatprep.subr.bf16.mxu1 %v983_v26  ;;  %v991_v33 = vpack.c.bf16 %v456_v29, %v455_v28  ;;  %v463_v37 = vmul.f32 %v462_v17, %v1637_v7  ;;  %v464_v38 = vmul.f32 %v462_v17, %v1639_v8 }
  0xa4   : > { %986 = vmatpush3.bf16.msra.mxu0 %v985_v30  ;;  %1018 = vmatpush3.bf16.msra.mxu1 %v985_v30  ;;  %v470_v39 = vrot.slane %v1635_v6, %v405_v13  ;;  %v399_v40 = vmul.f32 %v398_v32, %v1637_v7  ;;  %v400_v41 = vmul.f32 %v398_v32, %v1639_v8  ;;  %p1247_p4 = pnand %p1246_p2, %p1240_p10 }
  0xa5   : > { %988 = vmatprep.subr.bf16.mxu0 %v987_v27  ;;  %1020 = vmatprep.subr.bf16.mxu1 %v987_v27  ;;  %v406_v42 = vrot.slane %v1642_v10, %v405_v13  ;;  %v993_v43 = vpack.c.bf16 %v392_v35, %v391_v34  ;;  %v478_v44 = vrot.slane %v1635_v6, %v413_v36 }
  0xa6   : > { %v995_v46 = vpack.c.bf16 %v464_v38, %v463_v37  ;;  %v471_v47 = vmul.f32 %v470_v39, %v1637_v7  ;;  %v472_v48 = vmul.f32 %v470_v39, %v1639_v8  ;;  %v997_v50 = vpack.c.bf16 %v400_v41, %v399_v40 }
  0xa7   : > { %v407_v51 = vmul.f32 %v406_v42, %v1637_v7  ;;  %v414_v52 = vrot.slane %v1642_v10, %v413_v36  ;;  %v408_v55 = vmul.f32 %v406_v42, %v1639_v8  ;;  %v479_v56 = vmul.f32 %v478_v44, %v1637_v7 }
  0xa8   : > { %990 = vmatpush3.bf16.msra.mxu0 %v989_v31  ;;  %1022 = vmatpush3.bf16.msra.mxu1 %v989_v31  ;;  %v480_v57 = vmul.f32 %v478_v44, %v1639_v8  ;;  %v999_v58 = vpack.c.bf16 %v472_v48, %v471_v47  ;;  %v486_v59 = vrot.slane %v1635_v6, %v421_v49 }
  0xa9   : > { %992 = vmatprep.subr.bf16.mxu0 %v991_v33  ;;  %1024 = vmatprep.subr.bf16.mxu1 %v991_v33  ;;  %v415_v62 = vmul.f32 %v414_v52, %v1637_v7  ;;  %v416_v63 = vmul.f32 %v414_v52, %v1639_v8  ;;  %v1001_v0 = vpack.c.bf16 %v408_v55, %v407_v51 }
  0xaa   : > { %v1003_v2 = vpack.c.bf16 %v480_v57, %v479_v56  ;;  %v422_v3 = vrot.slane %v1642_v10, %v421_v49  ;;  %v487_v4 = vmul.f32 %v486_v59, %v1637_v7  ;;  %v488_v5 = vmul.f32 %v486_v59, %v1639_v8 }
  0xab   : > { %v494_v1 = vrot.slane %v1635_v6, %v429_v60  ;;  %v1005_v9 = vpack.c.bf16 %v416_v63, %v415_v62  ;;  %v430_v13 = vrot.slane %v1642_v10, %v429_v60 }
  0xac   : > { %994 = vmatpush3.bf16.msra.mxu0 %v993_v43  ;;  %1026 = vmatpush3.bf16.msra.mxu1 %v993_v43  ;;  %v423_v11 = vmul.f32 %v422_v3, %v1637_v7  ;;  %v424_v12 = vmul.f32 %v422_v3, %v1639_v8  ;;  %v1007_v14 = vpack.c.bf16 %v488_v5, %v487_v4 }
  0xad   : > { %996 = vmatprep.subr.bf16.mxu0 %v995_v46  ;;  %1028 = vmatprep.subr.bf16.mxu1 %v995_v46  ;;  %v495_v15 = vmul.f32 %v494_v1, %v1637_v7  ;;  %v496_v16 = vmul.f32 %v494_v1, %v1639_v8  ;;  %v431_v17 = vmul.f32 %v430_v13, %v1637_v7 }
  0xae   : > { %v1009_v6 = vpack.c.bf16 %v424_v12, %v423_v11  ;;  %v432_v18 = vmul.f32 %v430_v13, %v1639_v8 }
  0xaf   : > { %v1011_v19 = vpack.c.bf16 %v496_v16, %v495_v15 }
  0xb0   : > { %998 = vmatpush3.bf16.msra.mxu0 %v997_v50  ;;  %1030 = vmatpush3.bf16.msra.mxu1 %v997_v50  ;;  %v1013_v10 = vpack.c.bf16 %v432_v18, %v431_v17 }
  0xb1   : > { %1000 = vmatprep.subr.bf16.mxu0 %v999_v58  ;;  %1032 = vmatprep.subr.bf16.mxu1 %v999_v58 }
  0xb4   : > { %1002 = vmatpush3.bf16.msra.mxu0 %v1001_v0  ;;  %1034 = vmatpush3.bf16.msra.mxu1 %v1001_v0 }
  0xb5   : > { %1004 = vmatprep.subr.bf16.mxu0 %v1003_v2  ;;  %1036 = vmatprep.subr.bf16.mxu1 %v1003_v2 }
  0xb8   : > { %1006 = vmatpush3.bf16.msra.mxu0 %v1005_v9  ;;  %1038 = vmatpush3.bf16.msra.mxu1 %v1005_v9 }
  0xb9   : > { %1008 = vmatprep.subr.bf16.mxu0 %v1007_v14  ;;  %1040 = vmatprep.subr.bf16.mxu1 %v1007_v14 }
  0xbc   : > { %1010 = vmatpush3.bf16.msra.mxu0 %v1009_v6  ;;  %1042 = vmatpush3.bf16.msra.mxu1 %v1009_v6 }
  0xbd   : > { %1012 = vmatprep.subr.bf16.mxu0 %v1011_v19  ;;  %1044 = vmatprep.subr.bf16.mxu1 %v1011_v19 }
  0xc0   : > { %1014 = vmatpush3.bf16.msra.mxu0 %v1013_v10  ;;  %1046 = vmatpush3.bf16.msra.mxu1 %v1013_v10 }
  0xc3   : > { %600 = vmatmul.mubr.f32.vlgmr.msra.gmra.mrb[0].mxu0 %v531_v45  ;;  %675 = vmatmul.mubr.f32.vlgmr.msra.gmra.mrb[0].mxu1 %v606_v54 }
 0x196   : > { %v945_v7 = vpop.f32.mrb[0].mxu0  ;;  %v980_v20 = vpop.f32.mrb[0].mxu1 }
 0x197   : > { %v946_v8 = vpop.f32.mrb[1].mxu0  ;;  %v981_v21 = vpop.f32.mrb[1].mxu1 }
 0x198   : > { %v947_v22 = vadd.f32 %v946_v8, %v945_v7  ;;  %v982_v23 = vadd.f32 %v981_v21, %v980_v20 }
 0x19a   : > { %605 = vst [vmem:[%s359_s1] sm:$0xf] %v947_v22  ;;  %680 = vst [vmem:[%s366_s27] sm:$0xf] %v982_v23 }
 0x19b   : > { %1250 = shalt.err (!%p1247_p4)
}
 0x19c   : > { %s1251_s26 = scalar_lea.hbm %s1702_s25, 64  ;;  %s1255_s13 = scalar_lea.hbm %s1779_s4, 128 }
 0x19d   : > { %p1252_p0 = scmp.ne.s32.totalorder %s1702_s25, %s1251_s26  ;;  %p1256_p6 = scmp.lt.u32.totalorder %s1702_s25, %s1779_s4 }
 0x19e   : > { %p1257_p1 = scmp.lt.u32.totalorder %s1255_s13, %s1251_s26  ;;  %p1259_p13 = scmp.lt.u32.totalorder %s1251_s26, %s1702_s25 }
 0x19f   : > { %p1253_p5 = pnand %p1252_p0, %p1800_p11 }
 0x1a0   : > { %p1258_p9 = por %p1257_p1, %p1256_p6 }
 0x1a1   : > { %p1254_p3 = pneg %p1253_p5 }
 0x1a2   : > { %p1260_p8 = por %p1259_p13, %p1258_p9 }
 0x1a4   : > { %p1261_p10 = pnand %p1260_p8, %p1254_p3 }
 0x1a6   : > { %1264 = shalt.err (!%p1261_p10)
}
 0x1a7   : > { %1055 = dma.vmem_to_hbm [thread:$0]  (%p1800_p11), %s1704_s15, 64, %s1702_s25, %s682_s6  }
 0x1a8   : > { %s687_s14 = scalar_lea.sflag [#allocation13], %s1606_s0  ;;  %s1265_s17 = scalar_lea.vmem %s1711_s12, 64 }
 0x1a9   : > { %p1266_p7 = scmp.ne.s32.totalorder %s1711_s12, %s1265_s17  ;;  %s1352_s22 = smov [#allocation12]  }
 0x1aa   : > { %s1269_s7 = sshll.u32 %s1352_s22, 4  ;;  %s1270_s7 = int_to_ptr.vmem [resolvable:$false] %s1269_s7 }
 0x1ab   : > { %p1267_p12 = pnand %p1266_p7, %p1800_p11  ;;  %s1271_s23 = scalar_lea.vmem %s1270_s7, 128 }
 0x1ac   : > { %p1272_p4 = scmp.lt.s32.totalorder %s1711_s12, %s1270_s7  ;;  %p1273_p0 = scmp.lt.s32.totalorder %s1271_s23, %s1265_s17 }
 0x1ad   : > { %p1268_p2 = pneg %p1267_p12 }
 0x1ae   : > { %p1274_p5 = por %p1273_p0, %p1272_p4 }
 0x1b0   : > { %p1275_p3 = pnand %p1274_p5, %p1268_p2 }
 0x1b2   : > { %1278 = shalt.err (!%p1275_p3)
}
 0x1b3   : > { %s1279_s0 = scalar_lea.hbm %s1709_s9, 64  ;;  %s1283_s6 = scalar_lea.hbm %s1780_s5, 128 }
 0x1b4   : > { %p1280_p6 = scmp.ne.s32.totalorder %s1709_s9, %s1279_s0  ;;  %p1284_p13 = scmp.lt.u32.totalorder %s1709_s9, %s1780_s5 }
 0x1b5   : > { %p1285_p8 = scmp.lt.u32.totalorder %s1283_s6, %s1279_s0  ;;  %p1287_p7 = scmp.lt.u32.totalorder %s1279_s0, %s1709_s9 }
 0x1b6   : > { %p1281_p1 = pnand %p1280_p6, %p1800_p11 }
 0x1b7   : > { %p1286_p10 = por %p1285_p8, %p1284_p13 }
 0x1b8   : > { %p1282_p9 = pneg %p1281_p1 }
 0x1b9   : > { %p1288_p12 = por %p1287_p7, %p1286_p10 }
 0x1bb   : > { %p1289_p2 = pnand %p1288_p12, %p1282_p9 }
 0x1bd   : > { %1292 = shalt.err (!%p1289_p2)
}
 0x1be   : > { %1056 = dma.vmem_to_hbm [thread:$0]  (%p1800_p11), %s1711_s12, 64, %s1709_s9, %s687_s14  }
 0x1bf PF: > { %s725_s16 = sand.u32 1, %s1331_s18   ;;  %p1801_p4 = scmp.ne.s32.totalorder %s1789_s30, 0 }
 0x1c0   : > { %p1802_p0 = scmp.ge.s32.totalorder %s1343_s21, 2  ;;  %s726_s26 = scalar_lea.sflag [#allocation5], %s725_s16 }
 0x1c2   : > { %p1073_p5 = pnand %p1802_p0, %p1801_p4 }
 0x1c4   : > { %1322 = dma.done.wait (!%p1073_p5), %s726_s26, 64  }
 0x1c5   : > { %1324 = vsyncadd (!%p1073_p5), %s726_s26, 4294967232  ;;  %s735_s10 = scalar_lea.sflag [#allocation13], %s725_s16 }
 0x1c6   : > { %1326 = dma.done.wait (!%p1073_p5), %s735_s10, 64  }
 0x1c7   : > { %1328 = vsyncadd (!%p1073_p5), %s735_s10, 4294967232  ;;  %s1803_s29 = sld [smem:[#allocation19_spill]]  ;;  %p28_p11 = scmp.ge.s32.totalorder %s1408_s24, 4  }
 0x1c8   : > { %s1804_s18 = smov %s1335_s19  ;;  %s1805_s19 = smov %s1339_s20 }
 0x1c9   : > { %s1807_s21 = smov %s1408_s24  ;;  %30 = sbr.rel (!%p28_p11) target bundleno = 14 (0xe), region = 135 }
 0x1cd   : > { %s1806_s20 = smov %s1803_s29 }
 0x1d0   :  { %740 = vsyncpa [#allocation4], 1 }
 0x1d1   :  { %742 = vsyncpa [#allocation4 + $0x1], 1 }
 0x1d2   :  { %743 = vsyncpa [#allocation7], 1 }
 0x1d3   :  { %745 = vsyncpa [#allocation7 + $0x1], 1 }
 0x1d4   :  { %746 = vsyncpa [#allocation10], 1 }
 0x1d5   :  { %748 = vsyncpa [#allocation10 + $0x1], 1 }
 0x1d6   :  { %749 = vsyncpa [#allocation5], 1 }
 0x1d7   :  { %751 = vsyncpa [#allocation5 + $0x1], 1 }
 0x1d8   :  { %752 = vsyncpa [#allocation13], 1 }
 0x1d9   :  { %754 = vsyncpa [#allocation13 + $0x1], 1 }

</bundles_post_ra>
